<compile_context>
chip_gen: v6e
topology: v6e:2x2x1
jax: 0.10.0
libtpu: 0.0.40
codegen_flags: <defaults>
</compile_context>

<pallas_src>
import jax
import jax.numpy as jnp
from jax.experimental import pallas as pl
from jax.experimental.pallas import tpu as pltpu


def _round_up(x, m):
    return ((x + m - 1) // m) * m


# --------------------------------- wrapper ------------------------------------

def sequence_feature_mc_dropout(sta, temp, params, *, dropout_rate=0.2, rng=None):
    """sta: (B, F_sta); temp: (B, T, F_temp) batch-first. Returns (B, Hs + H)."""
    B, Fs = sta.shape
    _, T, Ft = temp.shape
    Hs = params["w_emb"].shape[1]
    E = params["w_temb"].shape[1]
    H = params["w_hh"].shape[0]
    f32 = jnp.float32

    # Common lane width for all packed slabs (lane-dense: multiple of 128).
    C = _round_up(max(Hs + E, 4 * H), 128)
    assert Hs + E <= C and 4 * H <= C

    Fin_pad = _round_up(Fs + Ft, 8)
    N_temp = T * B
    N_temp_pad = _round_up(N_temp, 8)
    B_pad = _round_up(B, 8)
    N_front = N_temp_pad + B_pad          # rows fed through the fused front-end
    H_pad = _round_up(H, 8)

    # Row offsets inside the packed weight slab (all sublane-aligned).
    R_IH = Fin_pad                        # W_ih (zero-padded to C rows)
    R_HH = R_IH + C                       # w_hh (H rows used)
    R_B1 = R_HH + H_pad                   # bias row: [b_emb | b_temb]
    R_B2 = R_B1 + 8                       # bias row: b_ih + b_hh
    R_W = R_B2 + 8

    # ---- operand 1: block-diagonal input rows --------------------------------
    # rows [0, T*B)                  : temporal features (time-major t*B + b)
    #                                  in cols [Fs, Fs+Ft)
    # rows [N_temp_pad, N_temp_pad+B): static features in cols [0, Fs)
    temp_flat = jnp.transpose(temp, (1, 0, 2)).reshape(N_temp, Ft).astype(f32)
    x_pack = jnp.zeros((N_front, Fin_pad), f32)
    x_pack = x_pack.at[0:N_temp, Fs:Fs + Ft].set(temp_flat)
    x_pack = x_pack.at[N_temp_pad:N_temp_pad + B, 0:Fs].set(sta.astype(f32))

    # ---- operand 2: all weights + biases in one lane-dense slab ---------------
    # Front-end output column layout: [0,Hs) static hidden | [Hs,Hs+E) temporal emb.
    w_pack = jnp.zeros((R_W, C), f32)
    w_pack = w_pack.at[0:Fs, 0:Hs].set(params["w_emb"].astype(f32))
    w_pack = w_pack.at[Fs:Fs + Ft, Hs:Hs + E].set(params["w_temb"].astype(f32))
    w_pack = w_pack.at[R_IH + Hs:R_IH + Hs + E, 0:4 * H].set(params["w_ih"].astype(f32))
    w_pack = w_pack.at[R_HH:R_HH + H, 0:4 * H].set(params["w_hh"].astype(f32))
    w_pack = w_pack.at[R_B1, 0:Hs].set(params["b_emb"][0].astype(f32))
    w_pack = w_pack.at[R_B1, Hs:Hs + E].set(params["b_temb"][0].astype(f32))
    w_pack = w_pack.at[R_B2, 0:4 * H].set(params["b_lstm"][0].astype(f32))

    # ---- operand 3: inverted-dropout keep masks (MC dropout: always active) ---
    # Zeros everywhere data must NOT flow (padding rows, bias broadcast into
    # unused lanes), so the same multiply both drops out and sanitizes.
    if rng is None:
        rng = jax.random.PRNGKey(0)
    k_sta, k_temp, k_h = jax.random.split(rng, 3)

    def keep_mask(k, shape):
        if dropout_rate <= 0.0:
            return jnp.ones(shape, f32)
        if dropout_rate >= 1.0:                      # guard 1/(1-p) blowup
            return jnp.zeros(shape, f32)
        keep = jax.random.uniform(k, shape) >= f32(dropout_rate)
        return keep.astype(f32) * (1.0 / (1.0 - dropout_rate))

    m_pack = jnp.zeros((N_front + B_pad, C), f32)
    m_pack = m_pack.at[0:N_temp, Hs:Hs + E].set(keep_mask(k_temp, (N_temp, E)))
    m_pack = m_pack.at[N_temp_pad:N_temp_pad + B, 0:Hs].set(keep_mask(k_sta, (B, Hs)))
    m_pack = m_pack.at[N_front:N_front + B, 0:H].set(keep_mask(k_h, (B, H)))

    # --------------------------------- kernel ---------------------------------
    def kernel(x_ref, w_ref, m_ref, out_ref):
        # Fused front-end: [static Linear | temporal embedding Linear] in one
        # block-diagonal matmul + one bias add + one dropout-mask multiply.
        w_front = w_ref[0:Fin_pad, :]
        b_front = w_ref[R_B1:R_B1 + 1, :]
        front = jnp.dot(x_ref[...], w_front,
                        preferred_element_type=jnp.float32) + b_front
        front = front * m_ref[0:N_front, :]

        # LSTM input projection for ALL timesteps in one matmul; result stays
        # in registers (no VMEM scratch).  W_ih rows outside [Hs, Hs+E) are 0,
        # so the static rows / padded lanes contribute nothing.
        w_ih = w_ref[R_IH:R_IH + C, :]
        b_lstm = w_ref[R_B2:R_B2 + 1, :]
        gx = jnp.dot(front, w_ih, preferred_element_type=jnp.float32) + b_lstm

        # Recurrence: h/c in registers, statically unrolled.  PyTorch gate
        # order i, f, g, o along the 4H axis.
        w_hh = w_ref[R_HH:R_HH + H, :]
        h = jnp.zeros((B, H), jnp.float32)
        c = jnp.zeros((B, H), jnp.float32)
        for t in range(T):                            # static trip count
            gates = gx[t * B:(t + 1) * B, :] + jnp.dot(
                h, w_hh, preferred_element_type=jnp.float32)
            sig = jax.nn.sigmoid(gates)               # one full-width EUP push
            tnh = jnp.tanh(gates)                     # one full-width EUP push
            i_g = sig[:, 0 * H:1 * H]
            f_g = sig[:, 1 * H:2 * H]
            o_g = sig[:, 3 * H:4 * H]
            g_g = tnh[:, 2 * H:3 * H]
            c = f_g * c + i_g * g_g
            h = o_g * jnp.tanh(c)

        # One lane-dense output block (single writeback DMA):
        #   rows [0, B)             : repr_sta (dropped) in lanes [0, Hs)
        #   rows [B_pad, B_pad + B) : h_n      (dropped) in lanes [0, H)
        out_ref[...] = jnp.zeros_like(out_ref)
        out_ref[0:B_pad, :] = front[N_temp_pad:N_front, :]
        out_ref[B_pad:B_pad + B, 0:H] = h * m_ref[N_front:N_front + B, 0:H]

    vmem = pl.BlockSpec(memory_space=pltpu.MemorySpace.VMEM)
    flops = 2 * (N_front * Fin_pad * C + N_front * C * C + T * B * H * C)
    transcendentals = T * B * (2 * C + H)
    bytes_accessed = 4 * (int(x_pack.size) + int(w_pack.size) + int(m_pack.size)
                          + 2 * B_pad * C)

    out = pl.pallas_call(
        kernel,
        out_shape=jax.ShapeDtypeStruct((2 * B_pad, C), f32),
        in_specs=[vmem, vmem, vmem],
        out_specs=vmem,
        cost_estimate=pl.CostEstimate(flops=int(flops),
                                      transcendentals=int(transcendentals),
                                      bytes_accessed=int(bytes_accessed)),
    )(x_pack, w_pack, m_pack)

    repr_sta = out[0:B, 0:Hs]
    repr_temp = out[B_pad:B_pad + B, 0:H]
    return jnp.concatenate([repr_sta, repr_temp], axis=1)


# ------------------------------- param init -----------------------------------

def init_params(key, n_feature_sta, n_feature_temp, n_hidden_sta,
                n_hidden_temp, n_embedding_temp):
    """PyTorch-style uniform init; weights stored pre-transposed as (in, out)
    so the kernel does x @ W; LSTM biases pre-summed (b_ih + b_hh)."""
    ks = jax.random.split(key, 8)

    def u(k, shape, fan_in):
        bound = 1.0 / jnp.sqrt(jnp.float32(fan_in))
        return jax.random.uniform(k, shape, jnp.float32, -bound, bound)

    E, H = n_embedding_temp, n_hidden_temp
    return {
        "w_emb":  u(ks[0], (n_feature_sta, n_hidden_sta), n_feature_sta),
        "b_emb":  u(ks[1], (1, n_hidden_sta), n_feature_sta),
        "w_temb": u(ks[2], (n_feature_temp, E), n_feature_temp),
        "b_temb": u(ks[3], (1, E), n_feature_temp),
        "w_ih":   u(ks[4], (E, 4 * H), H),   # gate order i, f, g, o
        "w_hh":   u(ks[5], (H, 4 * H), H),
        "b_lstm": u(ks[6], (1, 4 * H), H) + u(ks[7], (1, 4 * H), H),
    }


# ----------------------------------- main --------------------------------------

if __name__ == "__main__":
    # TODO(synk): model='gru' branch of the spec is not implemented (default 'lstm' path only).
    B, T = 2, 8
    n_feature_sta, n_feature_temp = 6, 5
    n_hidden_sta, n_hidden_temp = 16, 32
    n_embedding_temp = 12
    dropout_rate = 0.2

    key = jax.random.PRNGKey(0)
    k_sta, k_temp, k_par, k_drop = jax.random.split(key, 4)

    sta = jax.random.normal(k_sta, (B, n_feature_sta), jnp.float32)
    temp = jax.random.normal(k_temp, (B, T, n_feature_temp), jnp.float32)

    params = init_params(k_par, n_feature_sta, n_feature_temp,
                         n_hidden_sta, n_hidden_temp, n_embedding_temp)

    out = sequence_feature_mc_dropout(sta, temp, params,
                                      dropout_rate=dropout_rate, rng=k_drop)
    out = jax.block_until_ready(out)

    assert out.shape == (B, n_hidden_sta + n_hidden_temp)
    assert bool(jnp.all(jnp.isfinite(out)))
    print("KERNEL_OK")
</pallas_src>

<mosaic_0001>
module attributes {stable_mosaic.version = 11 : i64} {
  func.func @kernel(%arg0: memref<24x16xf32, #tpu.memory_space<vmem>>, %arg1: memref<192x128xf32, #tpu.memory_space<vmem>>, %arg2: memref<32x128xf32, #tpu.memory_space<vmem>>, %arg3: memref<16x128xf32, #tpu.memory_space<vmem>>) attributes {dimension_semantics = [], scalar_prefetch = 0 : i64, scratch_operands = 0 : i64, tpu.core_type = #tpu.core_type<tc>} {
    %c0 = arith.constant 0 : index
    %c0_0 = arith.constant 0 : index
    %0 = vector.load %arg1[%c0, %c0_0] : memref<192x128xf32, #tpu.memory_space<vmem>>, vector<16x128xf32>
    %c176 = arith.constant 176 : index
    %c0_1 = arith.constant 0 : index
    %1 = vector.load %arg1[%c176, %c0_1] : memref<192x128xf32, #tpu.memory_space<vmem>>, vector<1x128xf32>
    %c0_2 = arith.constant 0 : index
    %c0_3 = arith.constant 0 : index
    %2 = vector.load %arg0[%c0_2, %c0_3] : memref<24x16xf32, #tpu.memory_space<vmem>>, vector<24x16xf32>
    %cst = arith.constant dense<0.000000e+00> : vector<24x128xf32>
    %3 = tpu.matmul %2, %0, %cst {dimension_numbers = #tpu.dot_dimension_numbers<[1], [0], [0], [1], [0, 0, 1, 1], [], []>} : vector<24x16xf32>, vector<16x128xf32>, vector<24x128xf32> -> vector<24x128xf32>
    %4 = vector.broadcast %1 : vector<1x128xf32> to vector<24x128xf32>
    %5 = arith.addf %3, %4 : vector<24x128xf32>
    %c0_4 = arith.constant 0 : index
    %c0_5 = arith.constant 0 : index
    %6 = vector.load %arg2[%c0_4, %c0_5] : memref<32x128xf32, #tpu.memory_space<vmem>>, vector<24x128xf32>
    %7 = arith.mulf %5, %6 : vector<24x128xf32>
    %c16 = arith.constant 16 : index
    %c0_6 = arith.constant 0 : index
    %8 = vector.load %arg1[%c16, %c0_6] : memref<192x128xf32, #tpu.memory_space<vmem>>, vector<128x128xf32>
    %c184 = arith.constant 184 : index
    %c0_7 = arith.constant 0 : index
    %9 = vector.load %arg1[%c184, %c0_7] : memref<192x128xf32, #tpu.memory_space<vmem>>, vector<1x128xf32>
    %cst_8 = arith.constant dense<0.000000e+00> : vector<24x128xf32>
    %10 = tpu.matmul %7, %8, %cst_8 {dimension_numbers = #tpu.dot_dimension_numbers<[1], [0], [0], [1], [0, 0, 1, 1], [], []>} : vector<24x128xf32>, vector<128x128xf32>, vector<24x128xf32> -> vector<24x128xf32>
    %11 = vector.broadcast %9 : vector<1x128xf32> to vector<24x128xf32>
    %12 = arith.addf %10, %11 : vector<24x128xf32>
    %c144 = arith.constant 144 : index
    %c0_9 = arith.constant 0 : index
    %13 = vector.load %arg1[%c144, %c0_9] : memref<192x128xf32, #tpu.memory_space<vmem>>, vector<32x128xf32>
    %cst_10 = arith.constant 0.000000e+00 : f32
    %14 = vector.broadcast %cst_10 : f32 to vector<2x32xf32>
    %cst_11 = arith.constant 0.000000e+00 : f32
    %15 = vector.broadcast %cst_11 : f32 to vector<2x32xf32>
    %16 = vector.extract_strided_slice %12 {offsets = [0, 0], sizes = [2, 128], strides = [1, 1]} : vector<24x128xf32> to vector<2x128xf32>
    %cst_12 = arith.constant dense<0.000000e+00> : vector<2x128xf32>
    %17 = tpu.matmul %14, %13, %cst_12 {dimension_numbers = #tpu.dot_dimension_numbers<[1], [0], [0], [1], [0, 0, 1, 1], [], []>} : vector<2x32xf32>, vector<32x128xf32>, vector<2x128xf32> -> vector<2x128xf32>
    %18 = arith.addf %16, %17 : vector<2x128xf32>
    %19 = arith.negf %18 : vector<2x128xf32>
    %20 = math.exp %19 : vector<2x128xf32>
    %cst_13 = arith.constant 1.000000e+00 : f32
    %21 = vector.broadcast %cst_13 : f32 to vector<2x128xf32>
    %22 = arith.addf %21, %20 : vector<2x128xf32>
    %23 = arith.divf %21, %22 : vector<2x128xf32>
    %24 = math.tanh %18 : vector<2x128xf32>
    %25 = vector.extract_strided_slice %23 {offsets = [0, 0], sizes = [2, 32], strides = [1, 1]} : vector<2x128xf32> to vector<2x32xf32>
    %26 = vector.extract_strided_slice %23 {offsets = [0, 32], sizes = [2, 32], strides = [1, 1]} : vector<2x128xf32> to vector<2x32xf32>
    %27 = vector.extract_strided_slice %23 {offsets = [0, 96], sizes = [2, 32], strides = [1, 1]} : vector<2x128xf32> to vector<2x32xf32>
    %28 = vector.extract_strided_slice %24 {offsets = [0, 64], sizes = [2, 32], strides = [1, 1]} : vector<2x128xf32> to vector<2x32xf32>
    %29 = arith.mulf %26, %15 : vector<2x32xf32>
    %30 = arith.mulf %25, %28 : vector<2x32xf32>
    %31 = arith.addf %29, %30 : vector<2x32xf32>
    %32 = math.tanh %31 : vector<2x32xf32>
    %33 = arith.mulf %27, %32 : vector<2x32xf32>
    %34 = vector.extract_strided_slice %12 {offsets = [2, 0], sizes = [2, 128], strides = [1, 1]} : vector<24x128xf32> to vector<2x128xf32>
    %cst_14 = arith.constant dense<0.000000e+00> : vector<2x128xf32>
    %35 = tpu.matmul %33, %13, %cst_14 {dimension_numbers = #tpu.dot_dimension_numbers<[1], [0], [0], [1], [0, 0, 1, 1], [], []>} : vector<2x32xf32>, vector<32x128xf32>, vector<2x128xf32> -> vector<2x128xf32>
    %36 = arith.addf %34, %35 : vector<2x128xf32>
    %37 = arith.negf %36 : vector<2x128xf32>
    %38 = math.exp %37 : vector<2x128xf32>
    %cst_15 = arith.constant 1.000000e+00 : f32
    %39 = vector.broadcast %cst_15 : f32 to vector<2x128xf32>
    %40 = arith.addf %39, %38 : vector<2x128xf32>
    %41 = arith.divf %39, %40 : vector<2x128xf32>
    %42 = math.tanh %36 : vector<2x128xf32>
    %43 = vector.extract_strided_slice %41 {offsets = [0, 0], sizes = [2, 32], strides = [1, 1]} : vector<2x128xf32> to vector<2x32xf32>
    %44 = vector.extract_strided_slice %41 {offsets = [0, 32], sizes = [2, 32], strides = [1, 1]} : vector<2x128xf32> to vector<2x32xf32>
    %45 = vector.extract_strided_slice %41 {offsets = [0, 96], sizes = [2, 32], strides = [1, 1]} : vector<2x128xf32> to vector<2x32xf32>
    %46 = vector.extract_strided_slice %42 {offsets = [0, 64], sizes = [2, 32], strides = [1, 1]} : vector<2x128xf32> to vector<2x32xf32>
    %47 = arith.mulf %44, %31 : vector<2x32xf32>
    %48 = arith.mulf %43, %46 : vector<2x32xf32>
    %49 = arith.addf %47, %48 : vector<2x32xf32>
    %50 = math.tanh %49 : vector<2x32xf32>
    %51 = arith.mulf %45, %50 : vector<2x32xf32>
    %52 = vector.extract_strided_slice %12 {offsets = [4, 0], sizes = [2, 128], strides = [1, 1]} : vector<24x128xf32> to vector<2x128xf32>
    %cst_16 = arith.constant dense<0.000000e+00> : vector<2x128xf32>
    %53 = tpu.matmul %51, %13, %cst_16 {dimension_numbers = #tpu.dot_dimension_numbers<[1], [0], [0], [1], [0, 0, 1, 1], [], []>} : vector<2x32xf32>, vector<32x128xf32>, vector<2x128xf32> -> vector<2x128xf32>
    %54 = arith.addf %52, %53 : vector<2x128xf32>
    %55 = arith.negf %54 : vector<2x128xf32>
    %56 = math.exp %55 : vector<2x128xf32>
    %cst_17 = arith.constant 1.000000e+00 : f32
    %57 = vector.broadcast %cst_17 : f32 to vector<2x128xf32>
    %58 = arith.addf %57, %56 : vector<2x128xf32>
    %59 = arith.divf %57, %58 : vector<2x128xf32>
    %60 = math.tanh %54 : vector<2x128xf32>
    %61 = vector.extract_strided_slice %59 {offsets = [0, 0], sizes = [2, 32], strides = [1, 1]} : vector<2x128xf32> to vector<2x32xf32>
    %62 = vector.extract_strided_slice %59 {offsets = [0, 32], sizes = [2, 32], strides = [1, 1]} : vector<2x128xf32> to vector<2x32xf32>
    %63 = vector.extract_strided_slice %59 {offsets = [0, 96], sizes = [2, 32], strides = [1, 1]} : vector<2x128xf32> to vector<2x32xf32>
    %64 = vector.extract_strided_slice %60 {offsets = [0, 64], sizes = [2, 32], strides = [1, 1]} : vector<2x128xf32> to vector<2x32xf32>
    %65 = arith.mulf %62, %49 : vector<2x32xf32>
    %66 = arith.mulf %61, %64 : vector<2x32xf32>
    %67 = arith.addf %65, %66 : vector<2x32xf32>
    %68 = math.tanh %67 : vector<2x32xf32>
    %69 = arith.mulf %63, %68 : vector<2x32xf32>
    %70 = vector.extract_strided_slice %12 {offsets = [6, 0], sizes = [2, 128], strides = [1, 1]} : vector<24x128xf32> to vector<2x128xf32>
    %cst_18 = arith.constant dense<0.000000e+00> : vector<2x128xf32>
    %71 = tpu.matmul %69, %13, %cst_18 {dimension_numbers = #tpu.dot_dimension_numbers<[1], [0], [0], [1], [0, 0, 1, 1], [], []>} : vector<2x32xf32>, vector<32x128xf32>, vector<2x128xf32> -> vector<2x128xf32>
    %72 = arith.addf %70, %71 : vector<2x128xf32>
    %73 = arith.negf %72 : vector<2x128xf32>
    %74 = math.exp %73 : vector<2x128xf32>
    %cst_19 = arith.constant 1.000000e+00 : f32
    %75 = vector.broadcast %cst_19 : f32 to vector<2x128xf32>
    %76 = arith.addf %75, %74 : vector<2x128xf32>
    %77 = arith.divf %75, %76 : vector<2x128xf32>
    %78 = math.tanh %72 : vector<2x128xf32>
    %79 = vector.extract_strided_slice %77 {offsets = [0, 0], sizes = [2, 32], strides = [1, 1]} : vector<2x128xf32> to vector<2x32xf32>
    %80 = vector.extract_strided_slice %77 {offsets = [0, 32], sizes = [2, 32], strides = [1, 1]} : vector<2x128xf32> to vector<2x32xf32>
    %81 = vector.extract_strided_slice %77 {offsets = [0, 96], sizes = [2, 32], strides = [1, 1]} : vector<2x128xf32> to vector<2x32xf32>
    %82 = vector.extract_strided_slice %78 {offsets = [0, 64], sizes = [2, 32], strides = [1, 1]} : vector<2x128xf32> to vector<2x32xf32>
    %83 = arith.mulf %80, %67 : vector<2x32xf32>
    %84 = arith.mulf %79, %82 : vector<2x32xf32>
    %85 = arith.addf %83, %84 : vector<2x32xf32>
    %86 = math.tanh %85 : vector<2x32xf32>
    %87 = arith.mulf %81, %86 : vector<2x32xf32>
    %88 = vector.extract_strided_slice %12 {offsets = [8, 0], sizes = [2, 128], strides = [1, 1]} : vector<24x128xf32> to vector<2x128xf32>
    %cst_20 = arith.constant dense<0.000000e+00> : vector<2x128xf32>
    %89 = tpu.matmul %87, %13, %cst_20 {dimension_numbers = #tpu.dot_dimension_numbers<[1], [0], [0], [1], [0, 0, 1, 1], [], []>} : vector<2x32xf32>, vector<32x128xf32>, vector<2x128xf32> -> vector<2x128xf32>
    %90 = arith.addf %88, %89 : vector<2x128xf32>
    %91 = arith.negf %90 : vector<2x128xf32>
    %92 = math.exp %91 : vector<2x128xf32>
    %cst_21 = arith.constant 1.000000e+00 : f32
    %93 = vector.broadcast %cst_21 : f32 to vector<2x128xf32>
    %94 = arith.addf %93, %92 : vector<2x128xf32>
    %95 = arith.divf %93, %94 : vector<2x128xf32>
    %96 = math.tanh %90 : vector<2x128xf32>
    %97 = vector.extract_strided_slice %95 {offsets = [0, 0], sizes = [2, 32], strides = [1, 1]} : vector<2x128xf32> to vector<2x32xf32>
    %98 = vector.extract_strided_slice %95 {offsets = [0, 32], sizes = [2, 32], strides = [1, 1]} : vector<2x128xf32> to vector<2x32xf32>
    %99 = vector.extract_strided_slice %95 {offsets = [0, 96], sizes = [2, 32], strides = [1, 1]} : vector<2x128xf32> to vector<2x32xf32>
    %100 = vector.extract_strided_slice %96 {offsets = [0, 64], sizes = [2, 32], strides = [1, 1]} : vector<2x128xf32> to vector<2x32xf32>
    %101 = arith.mulf %98, %85 : vector<2x32xf32>
    %102 = arith.mulf %97, %100 : vector<2x32xf32>
    %103 = arith.addf %101, %102 : vector<2x32xf32>
    %104 = math.tanh %103 : vector<2x32xf32>
    %105 = arith.mulf %99, %104 : vector<2x32xf32>
    %106 = vector.extract_strided_slice %12 {offsets = [10, 0], sizes = [2, 128], strides = [1, 1]} : vector<24x128xf32> to vector<2x128xf32>
    %cst_22 = arith.constant dense<0.000000e+00> : vector<2x128xf32>
    %107 = tpu.matmul %105, %13, %cst_22 {dimension_numbers = #tpu.dot_dimension_numbers<[1], [0], [0], [1], [0, 0, 1, 1], [], []>} : vector<2x32xf32>, vector<32x128xf32>, vector<2x128xf32> -> vector<2x128xf32>
    %108 = arith.addf %106, %107 : vector<2x128xf32>
    %109 = arith.negf %108 : vector<2x128xf32>
    %110 = math.exp %109 : vector<2x128xf32>
    %cst_23 = arith.constant 1.000000e+00 : f32
    %111 = vector.broadcast %cst_23 : f32 to vector<2x128xf32>
    %112 = arith.addf %111, %110 : vector<2x128xf32>
    %113 = arith.divf %111, %112 : vector<2x128xf32>
    %114 = math.tanh %108 : vector<2x128xf32>
    %115 = vector.extract_strided_slice %113 {offsets = [0, 0], sizes = [2, 32], strides = [1, 1]} : vector<2x128xf32> to vector<2x32xf32>
    %116 = vector.extract_strided_slice %113 {offsets = [0, 32], sizes = [2, 32], strides = [1, 1]} : vector<2x128xf32> to vector<2x32xf32>
    %117 = vector.extract_strided_slice %113 {offsets = [0, 96], sizes = [2, 32], strides = [1, 1]} : vector<2x128xf32> to vector<2x32xf32>
    %118 = vector.extract_strided_slice %114 {offsets = [0, 64], sizes = [2, 32], strides = [1, 1]} : vector<2x128xf32> to vector<2x32xf32>
    %119 = arith.mulf %116, %103 : vector<2x32xf32>
    %120 = arith.mulf %115, %118 : vector<2x32xf32>
    %121 = arith.addf %119, %120 : vector<2x32xf32>
    %122 = math.tanh %121 : vector<2x32xf32>
    %123 = arith.mulf %117, %122 : vector<2x32xf32>
    %124 = vector.extract_strided_slice %12 {offsets = [12, 0], sizes = [2, 128], strides = [1, 1]} : vector<24x128xf32> to vector<2x128xf32>
    %cst_24 = arith.constant dense<0.000000e+00> : vector<2x128xf32>
    %125 = tpu.matmul %123, %13, %cst_24 {dimension_numbers = #tpu.dot_dimension_numbers<[1], [0], [0], [1], [0, 0, 1, 1], [], []>} : vector<2x32xf32>, vector<32x128xf32>, vector<2x128xf32> -> vector<2x128xf32>
    %126 = arith.addf %124, %125 : vector<2x128xf32>
    %127 = arith.negf %126 : vector<2x128xf32>
    %128 = math.exp %127 : vector<2x128xf32>
    %cst_25 = arith.constant 1.000000e+00 : f32
    %129 = vector.broadcast %cst_25 : f32 to vector<2x128xf32>
    %130 = arith.addf %129, %128 : vector<2x128xf32>
    %131 = arith.divf %129, %130 : vector<2x128xf32>
    %132 = math.tanh %126 : vector<2x128xf32>
    %133 = vector.extract_strided_slice %131 {offsets = [0, 0], sizes = [2, 32], strides = [1, 1]} : vector<2x128xf32> to vector<2x32xf32>
    %134 = vector.extract_strided_slice %131 {offsets = [0, 32], sizes = [2, 32], strides = [1, 1]} : vector<2x128xf32> to vector<2x32xf32>
    %135 = vector.extract_strided_slice %131 {offsets = [0, 96], sizes = [2, 32], strides = [1, 1]} : vector<2x128xf32> to vector<2x32xf32>
    %136 = vector.extract_strided_slice %132 {offsets = [0, 64], sizes = [2, 32], strides = [1, 1]} : vector<2x128xf32> to vector<2x32xf32>
    %137 = arith.mulf %134, %121 : vector<2x32xf32>
    %138 = arith.mulf %133, %136 : vector<2x32xf32>
    %139 = arith.addf %137, %138 : vector<2x32xf32>
    %140 = math.tanh %139 : vector<2x32xf32>
    %141 = arith.mulf %135, %140 : vector<2x32xf32>
    %142 = vector.extract_strided_slice %12 {offsets = [14, 0], sizes = [2, 128], strides = [1, 1]} : vector<24x128xf32> to vector<2x128xf32>
    %cst_26 = arith.constant dense<0.000000e+00> : vector<2x128xf32>
    %143 = tpu.matmul %141, %13, %cst_26 {dimension_numbers = #tpu.dot_dimension_numbers<[1], [0], [0], [1], [0, 0, 1, 1], [], []>} : vector<2x32xf32>, vector<32x128xf32>, vector<2x128xf32> -> vector<2x128xf32>
    %144 = arith.addf %142, %143 : vector<2x128xf32>
    %145 = arith.negf %144 : vector<2x128xf32>
    %146 = math.exp %145 : vector<2x128xf32>
    %cst_27 = arith.constant 1.000000e+00 : f32
    %147 = vector.broadcast %cst_27 : f32 to vector<2x128xf32>
    %148 = arith.addf %147, %146 : vector<2x128xf32>
    %149 = arith.divf %147, %148 : vector<2x128xf32>
    %150 = math.tanh %144 : vector<2x128xf32>
    %151 = vector.extract_strided_slice %149 {offsets = [0, 0], sizes = [2, 32], strides = [1, 1]} : vector<2x128xf32> to vector<2x32xf32>
    %152 = vector.extract_strided_slice %149 {offsets = [0, 32], sizes = [2, 32], strides = [1, 1]} : vector<2x128xf32> to vector<2x32xf32>
    %153 = vector.extract_strided_slice %149 {offsets = [0, 96], sizes = [2, 32], strides = [1, 1]} : vector<2x128xf32> to vector<2x32xf32>
    %154 = vector.extract_strided_slice %150 {offsets = [0, 64], sizes = [2, 32], strides = [1, 1]} : vector<2x128xf32> to vector<2x32xf32>
    %155 = arith.mulf %152, %139 : vector<2x32xf32>
    %156 = arith.mulf %151, %154 : vector<2x32xf32>
    %157 = arith.addf %155, %156 : vector<2x32xf32>
    %158 = math.tanh %157 : vector<2x32xf32>
    %159 = arith.mulf %153, %158 : vector<2x32xf32>
    %cst_28 = arith.constant 0.000000e+00 : f32
    %160 = vector.broadcast %cst_28 : f32 to vector<16x128xf32>
    %c0_29 = arith.constant 0 : index
    %c0_30 = arith.constant 0 : index
    %161 = vector.load %arg3[%c0_29, %c0_30] : memref<16x128xf32, #tpu.memory_space<vmem>>, vector<16x128xf32>
    tpu.vector_store %arg3[%c0_29, %c0_30], %160 {strides = array<i32>} : memref<16x128xf32, #tpu.memory_space<vmem>>, vector<16x128xf32>,
    %162 = vector.extract_strided_slice %7 {offsets = [16, 0], sizes = [8, 128], strides = [1, 1]} : vector<24x128xf32> to vector<8x128xf32>
    %c0_31 = arith.constant 0 : index
    %c0_32 = arith.constant 0 : index
    %163 = vector.load %arg3[%c0_31, %c0_32] : memref<16x128xf32, #tpu.memory_space<vmem>>, vector<8x128xf32>
    tpu.vector_store %arg3[%c0_31, %c0_32], %162 {strides = array<i32>} : memref<16x128xf32, #tpu.memory_space<vmem>>, vector<8x128xf32>,
    %c24 = arith.constant 24 : index
    %c0_33 = arith.constant 0 : index
    %164 = vector.load %arg2[%c24, %c0_33] : memref<32x128xf32, #tpu.memory_space<vmem>>, vector<2x32xf32>
    %165 = arith.mulf %159, %164 : vector<2x32xf32>
    %c8 = arith.constant 8 : index
    %c0_34 = arith.constant 0 : index
    %166 = vector.load %arg3[%c8, %c0_34] : memref<16x128xf32, #tpu.memory_space<vmem>>, vector<2x32xf32>
    tpu.vector_store %arg3[%c8, %c0_34], %165 {strides = array<i32>} : memref<16x128xf32, #tpu.memory_space<vmem>>, vector<2x32xf32>,
    return
  }
}

</mosaic_0001>

<bundles_post_ra>
// kernel: tpu_custom_call.1
= control target key start
LH: loop header
LB: loop body
LE: loop exit
PB: predicated region body
PF: predicated region fallthrough
CT: control target
= control target key end

     0   :  { %8 = vsyncpa [#allocation3], 0  ;;  %s1694_s0 = inlined_call_operand.vmem [shape: f32[24,16], index: 0, kind: input, shape index: {}]   ;;  %s1695_s1 = inlined_call_operand.hbm [shape: f32[192,128], index: 1, kind: input, shape index: {}]   ;;  %s1696_s2 = inlined_call_operand.vmem [shape: f32[32,128], index: 2, kind: input, shape index: {}]   ;;  %s1697_s3 = inlined_call_operand.hbm [shape: f32[16,128], index: 3, kind: output, shape index: {}]  }
   0x1   :  { %9 = vsyncpa [#allocation4], 0  ;;  %s1458_s12 = smov [#allocation2]  }
   0x2   :  { %s17_s13 = sshll.u32 %s1458_s12, 4  ;;  %s18_s13 = int_to_ptr.vmem [resolvable:$true] %s17_s13 }
   0x3   :  { %s1422_s14 = scalar_lea.vmem %s18_s13, 3072  ;;  %p1427_p1 = scmp.lt.s32.totalorder %s18_s13, %s18_s13 }
   0x4   :  { %p1423_p0 = scmp.ne.s32.totalorder %s18_s13, %s1422_s14  ;;  %p1428_p2 = scmp.lt.s32.totalorder %s1422_s14, %s1422_s14 }
   0x6   :  { %p1429_p3 = por %p1428_p2, %p1427_p1 }
   0x8   :  { %p1430_p4 = pnand %p1429_p3, %p1423_p0 }
   0xa   :  { %1433 = shalt.err (!%p1430_p4)
}
   0xb   :  { %s1459_s15 = smov 128   ;;  %s1460_s16 = smov 8  }
   0xc   :  { %23 = dma.hbm_to_vmem [thread:$0]  %s1695_s1, 3072, %s18_s13, [#allocation3], %s1459_s15, %s1459_s15, %s1460_s16  }
   0xd   :  { %1454 = dma.done.wait [#allocation3], 3072  }
   0xe   :  { %1455 = vsyncadd [#allocation3], 4294964224  ;;  %v1461_v0 = vmov 0.0   ;;  %vm1462_vm0 = vmmov 0   ;;  %v30_v1 = vld [vmem:[#allocation2 + $0x8] sm:$0xff]  ;;  %v29_v2 = vld [vmem:[#allocation2] sm:$0xff] }
   0xf   :  { %1199 = vmatprep.subr.mxu0 %v1461_v0  ;;  %1083 = vst [vmem:[#allocation5 + $0x8] sm:$0xff] %v1461_v0  ;;  %1203 = vmatprep.mubr.msk.f32.mxu0 %vm1462_vm0, %v1461_v0  ;;  %v32_v3 = vld [vmem:[%s1694_s0] sm:$0xff]  ;;  %vm39_vm1 = vcmask 130048   ;;  %v150_v4 = vld [vmem:[#allocation2 + $0x88] sm:$0xff]  ;;  %v148_v6 = vld [vmem:[#allocation2 + $0x78] sm:$0xff]  ;;  %s1463_s29 = smov 64  }
  0x10   :  { %1212 = vmatprep.subr.mxu1 %v1461_v0  ;;  %1244 = vmatprep.mubr.msk.f32.mxu1 %vm1462_vm0, %v1461_v0  ;;  %v149_v5 = vld [vmem:[#allocation2 + $0x80] sm:$0xff]  ;;  %v1506_v7 = vld [vmem:[#allocation2 + $0xa8] sm:$0xff]  ;;  %v147_v8 = vld [vmem:[#allocation2 + $0x70] sm:$0xff]  ;;  %s1464_s30 = smov 32   ;;  %vm239_vm2 = vcmask 261120   ;;  %s1465_s6 = smov 96  }
  0x11   :  { %1200 = vmatpush3.msra.mxu0 %v30_v1  ;;  %1213 = vmatpush3.msra.mxu1 %v150_v4  ;;  %v33_v9 = vld [vmem:[%s1694_s0 + $0x8] sm:$0xff]  ;;  %v1517_v11 = vld [vmem:[#allocation2 + $0xa0] sm:$0xff]  ;;  %v144_v13 = vld [vmem:[#allocation2 + $0x58] sm:$0xff]  ;;  %s1466_s7 = smov [#allocation5]   ;;  %vm1096_vm3 = vcmask 261126  }
  0x12   :  { %1201 = vmatprep.subr.mxu0 %v1461_v0  ;;  %1214 = vmatprep.subr.mxu1 %v1461_v0  ;;  %v146_v10 = vld [vmem:[#allocation2 + $0x68] sm:$0xff]  ;;  %v145_v12 = vld [vmem:[#allocation2 + $0x60] sm:$0xff]  ;;  %v143_v14 = vld [vmem:[#allocation2 + $0x50] sm:$0xff]  ;;  %s1103_s8 = sshll.u32 %s1466_s7, 4  ;;  %s1104_s8 = int_to_ptr.vmem [resolvable:$true] %s1103_s8 }
  0x13   :  { %1202 = vmatpush3.msra.mxu0 %v29_v2  ;;  %1215 = vmatpush3.msra.mxu1 %v149_v5  ;;  %v142_v15 = vld [vmem:[#allocation2 + $0x48] sm:$0xff]  ;;  %v141_v16 = vld [vmem:[#allocation2 + $0x40] sm:$0xff]  ;;  %v140_v17 = vld [vmem:[#allocation2 + $0x38] sm:$0xff]  ;;  %p1439_p6 = scmp.lt.s32.totalorder %s1104_s8, %s1104_s8 }
  0x14   :  { %1204 = vmatmul.mubr.msk.f32.vlgmr.msra.gmra.mxu0 %vm39_vm1, %v32_v3  ;;  %1216 = vmatprep.subr.mxu1 %v1461_v0  ;;  %v139_v18 = vld [vmem:[#allocation2 + $0x30] sm:$0xff]  ;;  %v138_v19 = vld [vmem:[#allocation2 + $0x28] sm:$0xff]  ;;  %v137_v20 = vld [vmem:[#allocation2 + $0x20] sm:$0xff] }
  0x15   :  { %1253 = vmatprep.subr.mxu0 %v1461_v0  ;;  %1217 = vmatpush3.msra.mxu1 %v148_v6  ;;  %v34_v21 = vld [vmem:[%s1694_s0 + $0x10] sm:$0xff]  ;;  %v1540_v22 = vld [vmem:[#allocation2 + $0x98] sm:$0xff]  ;;  %v129_v28 = vld [vmem:[%s1696_s2] sm:$0xff] }
  0x16   :  { %1254 = vmatpush3.msra.mxu0 %v1506_v7  ;;  %1218 = vmatprep.subr.mxu1 %v1461_v0  ;;  %v136_v23 = vld [vmem:[#allocation2 + $0x18] sm:$0xff]  ;;  %v135_v24 = vld [vmem:[#allocation2 + $0x10] sm:$0xff]  ;;  %v130_v33 = vld [vmem:[%s1696_s2 + $0x8] sm:$0xff] }
  0x17   :  { %1206 = vmatprep.mubr.msk.f32.mxu0 %vm1462_vm0, %v1461_v0  ;;  %1219 = vmatpush3.msra.mxu1 %v147_v8  ;;  %v1545_v25 = vld [vmem:[#allocation2 + $0x90] sm:$0xff]  ;;  %v1119_v44 = vld [vmem:[#allocation2 + $0xb8] ss:$0 sm:$0xff] }
  0x18   :  { %1207 = vmatmul.mubr.msk.f32.gmra.mxu0 %vm39_vm1, %v33_v9  ;;  %1220 = vmatprep.subr.mxu1 %v1461_v0  ;;  %v1115_v26 = vld [vmem:[#allocation2 + $0xb0] ss:$0 sm:$0xff] }
  0x19   :  { %1255 = vmatprep.subr.mxu0 %v1461_v0  ;;  %1221 = vmatpush3.msra.mxu1 %v146_v10  ;;  %v131_v38 = vld [vmem:[%s1696_s2 + $0x10] sm:$0xff] }
  0x1a   :  { %1256 = vmatpush3.msra.mxu0 %v1517_v11  ;;  %1222 = vmatprep.subr.mxu1 %v1461_v0 }
  0x1b   :  { %1209 = vmatprep.mubr.msk.f32.mxu0 %vm1462_vm0, %v1461_v0  ;;  %1223 = vmatpush3.msra.mxu1 %v145_v12 }
  0x1c   :  { %1257 = vmatprep.subr.mxu0 %v1461_v0  ;;  %1224 = vmatprep.subr.mxu1 %v1461_v0 }
  0x1d   :  { %1225 = vmatpush3.msra.mxu1 %v144_v13  ;;  %1210 = vmatmul.mubr.msk.f32.gmra.mxu0 %vm39_vm1, %v34_v21 }
  0x1e   :  { %1226 = vmatprep.subr.mxu1 %v1461_v0  ;;  %1258 = vmatpush3.msra.mxu0 %v1540_v22 }
  0x1f   :  { %1227 = vmatpush3.msra.mxu1 %v143_v14  ;;  %1259 = vmatprep.subr.mxu0 %v1461_v0 }
  0x20   :  { %1228 = vmatprep.subr.mxu1 %v1461_v0  ;;  %1260 = vmatpush3.msra.mxu0 %v1545_v25 }
  0x21   :  { %1229 = vmatpush3.msra.mxu1 %v142_v15  ;;  %1261 = vmatprep.mubr.msk.f32.mxu0 %vm1462_vm0, %v1461_v0 }
  0x22   :  { %1230 = vmatprep.subr.mxu1 %v1461_v0  ;;  %1264 = vmatprep.subr.mxu0 %v1461_v0 }
  0x23   :  { %1231 = vmatpush3.msra.mxu1 %v141_v16  ;;  %1262 = vmatmul.mubr.f32.vlgmr.msra.gmra.mxu0 %v1461_v0 }
  0x24   :  { %1232 = vmatprep.subr.mxu1 %v1461_v0  ;;  %1265 = vmatpush3.msra.mxu0 %v1506_v7 }
  0x25   :  { %1233 = vmatpush3.msra.mxu1 %v140_v17  ;;  %1272 = vmatprep.mubr.msk.f32.mxu0 %vm1462_vm0, %v1461_v0 }
  0x26   :  { %1234 = vmatprep.subr.mxu1 %v1461_v0  ;;  %1266 = vmatprep.subr.mxu0 %v1461_v0 }
  0x27   :  { %1235 = vmatpush3.msra.mxu1 %v139_v18  ;;  %1267 = vmatpush3.msra.mxu0 %v1517_v11 }
  0x28   :  { %1236 = vmatprep.subr.mxu1 %v1461_v0  ;;  %1268 = vmatprep.subr.mxu0 %v1461_v0 }
  0x29   :  { %1237 = vmatpush3.msra.mxu1 %v138_v19  ;;  %1269 = vmatpush3.msra.mxu0 %v1540_v22 }
  0x2a   :  { %1238 = vmatprep.subr.mxu1 %v1461_v0  ;;  %1270 = vmatprep.subr.mxu0 %v1461_v0 }
  0x2b   :  { %1239 = vmatpush3.msra.mxu1 %v137_v20  ;;  %1271 = vmatpush3.msra.mxu0 %v1545_v25 }
  0x2c   :  { %1240 = vmatprep.subr.mxu1 %v1461_v0  ;;  %1275 = vmatprep.subr.mxu0 %v1461_v0 }
  0x2d   :  { %1241 = vmatpush3.msra.mxu1 %v136_v23 }
  0x2e   :  { %1242 = vmatprep.subr.mxu1 %v1461_v0 }
  0x2f   :  { %1243 = vmatpush3.msra.mxu1 %v135_v24 }
  0x30   :  { %1297 = vmatprep.subr.mxu1 %v1461_v0 }
  0xd4   :  { %v115_v27 = vpop.f32.mrf.mxu0 }
  0xd5   :  { %v116_v29 = vadd.f32 %v1115_v26, %v115_v27 }
  0xd6   :  { %v1205_v30 = vpop.f32.mrf.mxu0 }
  0xd7   :  { %v132_v31 = vmul.f32 %v129_v28, %v116_v29 }
  0xd8   :  { %v120_v32 = vpop.f32.mrf.mxu0 }
  0xd9   :  { %1245 = vmatmul.mubr.f32.vlgmr.msra.gmra.mxu1 %v132_v31  ;;  %v121_v34 = vadd.f32 %v1115_v26, %v120_v32 }
  0xda   :  { %v1208_v35 = vpop.f32.mrf.mxu0  ;;  %1247 = vmatprep.mubr.msk.f32.mxu1 %vm1462_vm0, %v1461_v0  ;;  %1298 = vmatpush3.msra.mxu1 %v1506_v7 }
  0xdb   :  { %v133_v36 = vmul.f32 %v130_v33, %v121_v34  ;;  %1299 = vmatprep.subr.mxu1 %v1461_v0 }
  0xdc   :  { %1300 = vmatpush3.msra.mxu1 %v1517_v11 }
  0xdd   :  { %1248 = vmatmul.mubr.f32.gmra.mxu1 %v133_v36  ;;  %1301 = vmatprep.subr.mxu1 %v1461_v0  ;;  %v125_v37 = vpop.f32.mrf.mxu0 }
  0xde   :  { %1250 = vmatprep.mubr.msk.f32.mxu1 %vm1462_vm0, %v1461_v0  ;;  %1302 = vmatpush3.msra.mxu1 %v1540_v22  ;;  %v126_v39 = vadd.f32 %v1115_v26, %v125_v37 }
  0xdf   :  { %1303 = vmatprep.subr.mxu1 %v1461_v0  ;;  %v1211_v40 = vpop.f32.mrf.mxu0 }
  0xe0   :  { %1304 = vmatpush3.msra.mxu1 %v1545_v25  ;;  %v134_v41 = vmul.f32 %v131_v38, %v126_v39 }
  0xe1   :  { %1319 = vmatprep.subr.mxu1 %v1461_v0 }
  0xe2   :  { %1084 = vst [vmem:[#allocation5] sm:$0xff] %v134_v41  ;;  %1251 = vmatmul.mubr.f32.gmra.mxu1 %v134_v41 }
  0xe3   :  { %v309_v42 = vpop.f32.mrf.mxu0  ;;  %1305 = vmatprep.mubr.msk.f32.mxu1 %vm1462_vm0, %v1461_v0 }
  0xe5   :  { %v1263_v43 = vpop.f32.mrf.mxu0 }
 0x199   :  { %v222_v45 = vpop.f32.mrf.mxu1 }
 0x19a   :  { %v1586_v46 = vadd.f32 %v1119_v44, %v222_v45 }
 0x19b   :  { %v1246_v47 = vpop.f32.mrf.mxu1 }
 0x19c   :  { %v313_v48 = vadd.f32 %v309_v42, %v1586_v46 }
 0x19d   :  { %v227_v49 = vpop.f32.mrf.mxu1 }
 0x19e   :  { %1350 = vtanh.f32 %v313_v48  ;;  %v1589_v50 = vadd.f32 %v1119_v44, %v227_v49  ;;  %v1120_v55 = vmul.f32 -1.442695, %v313_v48 }
 0x19f   :  { %v1249_v51 = vpop.f32.mrf.mxu1 }
 0x1a0   :  { %1352 = vpow2.f32 %v1120_v55 }
 0x1a2   :  { %v232_v53 = vpop.f32.mrf.mxu1 }
 0x1a4   :  { %v1252_v54 = vpop.f32.mrf.mxu1 }
 0x1ab   :  { %v1351_v52 = vpop.eup %1350 }
 0x1ac   :  { %323 = vrot.lane.b32.xlu0 %v1351_v52, %s1463_s29 }
 0x1ad   :  { %v1353_v56 = vpop.eup %1352 }
 0x1ae   :  { %v317_v57 = vadd.f32 1.0, %v1353_v56 }
 0x1b0   :  { %1354 = vrcp.f32 %v317_v57 }
 0x1bd   :  { %v1355_v58 = vpop.eup %1354 }
 0x1be   :  { %v321_v61 = vmul.f32 0.0, %v1355_v58 }
 0x21e   :  { %v324_v59 = vpop.permute.xlu0 %323 }
 0x21f   :  { %v326_v60 = vmul.f32 %v1355_v58, %v324_v59 }
 0x221   :  { %328 = vrot.lane.b32.xlu0 %v326_v60, %s1464_s30 }
 0x293   :  { %v329_v62 = vpop.permute.xlu0 %328 }
 0x294   :  { %v331_v63 = vadd.f32 %v329_v62, %v321_v61 }
 0x296   :  { %1356 = vtanh.f32 %v331_v63  ;;  %v425_v18 = vrot.slane %v331_v63, 6 }
 0x2a3   :  { %v1357_v1 = vpop.eup %1356 }
 0x2a4   :  { %334 = vrot.lane.b32.xlu1 %v1357_v1, %s1463_s29 }
 0x316   :  { %v335_v2 = vpop.permute.xlu1 %334 }
 0x317   :  { %v337_v3 = vmul.f32 %v1355_v58, %v335_v2 }
 0x319   :  { %339 = vrot.lane.b32.xlu1 %v337_v3, %s1464_s30 }
 0x38b   :  { %v340_v4 = vpop.permute.xlu1 %339 }
 0x38c   :  { %1273 = vmatmul.mubr.msk.f32.vlgmr.msra.gmra.mxu0 %vm239_vm2, %v340_v4 }
 0x38d   :  { %1276 = vmatpush3.msra.mxu0 %v1506_v7  ;;  %1283 = vmatprep.mubr.msk.f32.mxu0 %vm1462_vm0, %v1461_v0 }
 0x38e   :  { %1277 = vmatprep.subr.mxu0 %v1461_v0 }
 0x38f   :  { %1278 = vmatpush3.msra.mxu0 %v1517_v11 }
 0x390   :  { %1279 = vmatprep.subr.mxu0 %v1461_v0 }
 0x391   :  { %1280 = vmatpush3.msra.mxu0 %v1540_v22 }
 0x392   :  { %1281 = vmatprep.subr.mxu0 %v1461_v0 }
 0x393   :  { %1282 = vmatpush3.msra.mxu0 %v1545_v25 }
 0x394   :  { %1286 = vmatprep.subr.mxu0 %v1461_v0 }
 0x44c   :  { %v409_v5 = vpop.f32.mrf.mxu0 }
 0x44d   :  { %v414_v6 = vrot.slane %v409_v5, 6 }
 0x44e   :  { %v1274_v8 = vpop.f32.mrf.mxu0 }
 0x44f   :  { %v416_v9 = vadd.f32 %v414_v6, %v1586_v46 }
 0x451   :  { %1358 = vtanh.f32 %v416_v9  ;;  %v1122_v12 = vmul.f32 -1.442695, %v416_v9 }
 0x453   :  { %1360 = vpow2.f32 %v1122_v12 }
 0x45e   :  { %v1359_v10 = vpop.eup %1358 }
 0x45f   :  { %429 = vrot.lane.b32.xlu0 %v1359_v10, %s1463_s29 }
 0x460   :  { %v1361_v13 = vpop.eup %1360 }
 0x461   :  { %v420_v14 = vadd.f32 1.0, %v1361_v13 }
 0x463   :  { %1362 = vrcp.f32 %v420_v14 }
 0x470   :  { %v1363_v15 = vpop.eup %1362 }
 0x471   :  { %v427_v19 = vmul.f32 %v1363_v15, %v425_v18 }
 0x4d1   :  { %v430_v16 = vpop.permute.xlu0 %429 }
 0x4d2   :  { %v432_v17 = vmul.f32 %v1363_v15, %v430_v16 }
 0x4d4   :  { %434 = vrot.lane.b32.xlu1 %v432_v17, %s1464_s30 }
 0x546   :  { %v435_v20 = vpop.permute.xlu1 %434 }
 0x547   :  { %v437_v21 = vadd.f32 %v435_v20, %v427_v19 }
 0x549   :  { %1364 = vtanh.f32 %v437_v21  ;;  %v532_v40 = vrot.slane %v437_v21, 6 }
 0x556   :  { %v1365_v23 = vpop.eup %1364 }
 0x557   :  { %440 = vrot.lane.b32.xlu0 %v1365_v23, %s1463_s29 }
 0x5c9   :  { %v441_v24 = vpop.permute.xlu0 %440 }
 0x5ca   :  { %v443_v26 = vmul.f32 %v1363_v15, %v441_v24 }
 0x5cc   :  { %v445_v27 = vrot.slane %v443_v26, 2 }
 0x5ce   :  { %446 = vrot.lane.b32.xlu1 %v445_v27, %s1464_s30 }
 0x640   :  { %v447_v28 = vpop.permute.xlu1 %446 }
 0x641   :  { %1284 = vmatmul.mubr.msk.f32.vlgmr.msra.gmra.mxu0 %vm239_vm2, %v447_v28 }
 0x642   :  { %1287 = vmatpush3.msra.mxu0 %v1506_v7  ;;  %1294 = vmatprep.mubr.msk.f32.mxu0 %vm1462_vm0, %v1461_v0 }
 0x643   :  { %1288 = vmatprep.subr.mxu0 %v1461_v0 }
 0x644   :  { %1289 = vmatpush3.msra.mxu0 %v1517_v11 }
 0x645   :  { %1290 = vmatprep.subr.mxu0 %v1461_v0 }
 0x646   :  { %1291 = vmatpush3.msra.mxu0 %v1540_v22 }
 0x647   :  { %1292 = vmatprep.subr.mxu0 %v1461_v0 }
 0x648   :  { %1293 = vmatpush3.msra.mxu0 %v1545_v25 }
 0x649   :  { %1308 = vmatprep.subr.mxu0 %v1461_v0 }
 0x701   :  { %v516_v29 = vpop.f32.mrf.mxu0 }
 0x702   :  { %v521_v30 = vrot.slane %v516_v29, 4 }
 0x703   :  { %v1285_v31 = vpop.f32.mrf.mxu0 }
 0x704   :  { %v523_v32 = vadd.f32 %v521_v30, %v1586_v46 }
 0x706   :  { %1366 = vtanh.f32 %v523_v32  ;;  %v1124_v34 = vmul.f32 -1.442695, %v523_v32 }
 0x708   :  { %1368 = vpow2.f32 %v1124_v34 }
 0x713   :  { %v1367_v33 = vpop.eup %1366 }
 0x714   :  { %536 = vrot.lane.b32.xlu0 %v1367_v33, %s1463_s29 }
 0x715   :  { %v1369_v35 = vpop.eup %1368 }
 0x716   :  { %v527_v36 = vadd.f32 1.0, %v1369_v35 }
 0x718   :  { %1370 = vrcp.f32 %v527_v36 }
 0x725   :  { %v1371_v37 = vpop.eup %1370 }
 0x726   :  { %v534_v41 = vmul.f32 %v1371_v37, %v532_v40 }
 0x786   :  { %v537_v38 = vpop.permute.xlu0 %536 }
 0x787   :  { %v539_v39 = vmul.f32 %v1371_v37, %v537_v38 }
 0x789   :  { %541 = vrot.lane.b32.xlu1 %v539_v39, %s1464_s30 }
 0x7fb   :  { %v542_v42 = vpop.permute.xlu1 %541 }
 0x7fc   :  { %v544_v43 = vadd.f32 %v542_v42, %v534_v41 }
 0x7fe   :  { %1372 = vtanh.f32 %v544_v43  ;;  %v639_v62 = vrot.slane %v544_v43, 6 }
 0x80b   :  { %v1373_v44 = vpop.eup %1372 }
 0x80c   :  { %547 = vrot.lane.b32.xlu0 %v1373_v44, %s1463_s29 }
 0x87e   :  { %v548_v45 = vpop.permute.xlu0 %547 }
 0x87f   :  { %v550_v47 = vmul.f32 %v1371_v37, %v548_v45 }
 0x881   :  { %v552_v48 = vrot.slane %v550_v47, 4 }
 0x883   :  { %553 = vrot.lane.b32.xlu1 %v552_v48, %s1464_s30 }
 0x8f5   :  { %v554_v49 = vpop.permute.xlu1 %553 }
 0x8f6   :  { %1295 = vmatmul.mubr.msk.f32.vlgmr.msra.gmra.mxu0 %vm239_vm2, %v554_v49 }
 0x8f7   :  { %1309 = vmatpush3.msra.mxu0 %v1506_v7  ;;  %1316 = vmatprep.mubr.msk.f32.mxu0 %vm1462_vm0, %v1461_v0 }
 0x8f8   :  { %1310 = vmatprep.subr.mxu0 %v1461_v0 }
 0x8f9   :  { %1311 = vmatpush3.msra.mxu0 %v1517_v11 }
 0x8fa   :  { %1312 = vmatprep.subr.mxu0 %v1461_v0 }
 0x8fb   :  { %1313 = vmatpush3.msra.mxu0 %v1540_v22 }
 0x8fc   :  { %1314 = vmatprep.subr.mxu0 %v1461_v0 }
 0x8fd   :  { %1315 = vmatpush3.msra.mxu0 %v1545_v25 }
 0x8fe   :  { %1330 = vmatprep.subr.mxu0 %v1461_v0 }
 0x9b6   :  { %v623_v51 = vpop.f32.mrf.mxu0 }
 0x9b7   :  { %v628_v52 = vrot.slane %v623_v51, 2 }
 0x9b8   :  { %v1296_v53 = vpop.f32.mrf.mxu0 }
 0x9b9   :  { %v630_v54 = vadd.f32 %v628_v52, %v1586_v46 }
 0x9bb   :  { %1374 = vtanh.f32 %v630_v54  ;;  %v1126_v56 = vmul.f32 -1.442695, %v630_v54 }
 0x9bd   :  { %1376 = vpow2.f32 %v1126_v56 }
 0x9c8   :  { %v1375_v55 = vpop.eup %1374 }
 0x9c9   :  { %643 = vrot.lane.b32.xlu0 %v1375_v55, %s1463_s29 }
 0x9ca   :  { %v1377_v57 = vpop.eup %1376 }
 0x9cb   :  { %v634_v58 = vadd.f32 1.0, %v1377_v57 }
 0x9cd   :  { %1378 = vrcp.f32 %v634_v58 }
 0x9da   :  { %v1379_v59 = vpop.eup %1378 }
 0x9db   :  { %v641_v63 = vmul.f32 %v1379_v59, %v639_v62 }
 0xa3b   :  { %v644_v60 = vpop.permute.xlu0 %643 }
 0xa3c   :  { %v646_v61 = vmul.f32 %v1379_v59, %v644_v60 }
 0xa3e   :  { %648 = vrot.lane.b32.xlu1 %v646_v61, %s1464_s30 }
 0xab0   :  { %v649_v1 = vpop.permute.xlu1 %648 }
 0xab1   :  { %v651_v2 = vadd.f32 %v649_v1, %v641_v63 }
 0xab3   :  { %1380 = vtanh.f32 %v651_v2  ;;  %v743_v19 = vrot.slane %v651_v2, 6 }
 0xac0   :  { %v1381_v46 = vpop.eup %1380 }
 0xac1   :  { %654 = vrot.lane.b32.xlu0 %v1381_v46, %s1463_s29 }
 0xb33   :  { %v655_v3 = vpop.permute.xlu0 %654 }
 0xb34   :  { %v657_v4 = vmul.f32 %v1379_v59, %v655_v3 }
 0xb36   :  { %v659_v5 = vrot.slane %v657_v4, 6 }
 0xb38   :  { %660 = vrot.lane.b32.xlu1 %v659_v5, %s1464_s30 }
 0xbaa   :  { %v661_v6 = vpop.permute.xlu1 %660 }
 0xbab   :  { %1306 = vmatmul.mubr.msk.f32.vlgmr.msra.gmra.mxu1 %vm239_vm2, %v661_v6 }
 0xbac   :  { %1320 = vmatpush3.msra.mxu1 %v1506_v7  ;;  %1327 = vmatprep.mubr.msk.f32.mxu1 %vm1462_vm0, %v1461_v0 }
 0xbad   :  { %1321 = vmatprep.subr.mxu1 %v1461_v0 }
 0xbae   :  { %1322 = vmatpush3.msra.mxu1 %v1517_v11 }
 0xbaf   :  { %1323 = vmatprep.subr.mxu1 %v1461_v0 }
 0xbb0   :  { %1324 = vmatpush3.msra.mxu1 %v1540_v22 }
 0xbb1   :  { %1325 = vmatprep.subr.mxu1 %v1461_v0 }
 0xbb2   :  { %1326 = vmatpush3.msra.mxu1 %v1545_v25 }
 0xc6b   :  { %v730_v8 = vpop.f32.mrf.mxu1 }
 0xc6c   :  { %v734_v9 = vadd.f32 %v730_v8, %v1589_v50 }
 0xc6d   :  { %v1307_v10 = vpop.f32.mrf.mxu1 }
 0xc6e   :  { %1382 = vtanh.f32 %v734_v9  ;;  %v1128_v13 = vmul.f32 -1.442695, %v734_v9 }
 0xc70   :  { %1384 = vpow2.f32 %v1128_v13 }
 0xc7b   :  { %v1383_v12 = vpop.eup %1382 }
 0xc7c   :  { %747 = vrot.lane.b32.xlu0 %v1383_v12, %s1463_s29 }
 0xc7d   :  { %v1385_v14 = vpop.eup %1384 }
 0xc7e   :  { %v738_v15 = vadd.f32 1.0, %v1385_v14 }
 0xc80   :  { %1386 = vrcp.f32 %v738_v15  ;;  %v1085_v15 = vld [vmem:[%s1696_s2 + $0x18] sm:$0x3]  ;;  %s1434_s2 = scalar_lea.vmem %s1104_s8, 256 }
 0xc81   :  { %p1435_p5 = scmp.ne.s32.totalorder %s1104_s8, %s1434_s2  ;;  %p1440_p7 = scmp.lt.s32.totalorder %s1434_s2, %s1434_s2 }
 0xc83   :  { %p1441_p8 = por %p1440_p7, %p1439_p6 }
 0xc85   :  { %p1442_p9 = pnand %p1441_p8, %p1435_p5 }
 0xc8d   :  { %v1387_v16 = vpop.eup %1386 }
 0xc8e   :  { %v745_v20 = vmul.f32 %v1387_v16, %v743_v19 }
 0xcee   :  { %v748_v17 = vpop.permute.xlu0 %747 }
 0xcef   :  { %v750_v18 = vmul.f32 %v1387_v16, %v748_v17 }
 0xcf1   :  { %752 = vrot.lane.b32.xlu1 %v750_v18, %s1464_s30 }
 0xd63   :  { %v753_v21 = vpop.permute.xlu1 %752 }
 0xd64   :  { %v755_v23 = vadd.f32 %v753_v21, %v745_v20 }
 0xd66   :  { %1388 = vtanh.f32 %v755_v23 }
 0xd73   :  { %v1389_v24 = vpop.eup %1388 }
 0xd74   :  { %758 = vrot.lane.b32.xlu0 %v1389_v24, %s1463_s29 }
 0xde6   :  { %v759_v26 = vpop.permute.xlu0 %758 }
 0xde7   :  { %v761_v27 = vmul.f32 %v1387_v16, %v759_v26  ;;  %v1087_v16 = vrot.slane %v1085_v15, 2 }
 0xde9   :  { %763 = vrot.lane.b32.xlu1 %v761_v27, %s1464_s30 }
 0xe5b   :  { %v764_v28 = vpop.permute.xlu1 %763 }
 0xe5c   :  { %1317 = vmatmul.mubr.msk.f32.vlgmr.msra.gmra.mxu0 %vm239_vm2, %v764_v28 }
 0xe5d   :  { %1331 = vmatpush3.msra.mxu0 %v1506_v7  ;;  %1338 = vmatprep.mubr.msk.f32.mxu0 %vm1462_vm0, %v1461_v0 }
 0xe5e   :  { %1332 = vmatprep.subr.mxu0 %v1461_v0 }
 0xe5f   :  { %1333 = vmatpush3.msra.mxu0 %v1517_v11 }
 0xe60   :  { %1334 = vmatprep.subr.mxu0 %v1461_v0 }
 0xe61   :  { %1335 = vmatpush3.msra.mxu0 %v1540_v22 }
 0xe62   :  { %1336 = vmatprep.subr.mxu0 %v1461_v0  ;;  %v849_v0 = vrot.slane %v755_v23, 6 }
 0xe63   :  { %1337 = vmatpush3.msra.mxu0 %v1545_v25 }
 0xf1c   :  { %v833_v29 = vpop.f32.mrf.mxu0 }
 0xf1d   :  { %v838_v30 = vrot.slane %v833_v29, 6 }
 0xf1e   :  { %v1318_v31 = vpop.f32.mrf.mxu0 }
 0xf1f   :  { %v840_v7 = vadd.f32 %v838_v30, %v1589_v50 }
 0xf21   :  { %1390 = vtanh.f32 %v840_v7  ;;  %v1130_v33 = vmul.f32 -1.442695, %v840_v7 }
 0xf23   :  { %1392 = vpow2.f32 %v1130_v33 }
 0xf2e   :  { %v1391_v32 = vpop.eup %1390 }
 0xf2f   :  { %853 = vrot.lane.b32.xlu0 %v1391_v32, %s1463_s29 }
 0xf30   :  { %v1393_v11 = vpop.eup %1392 }
 0xf31   :  { %v844_v34 = vadd.f32 1.0, %v1393_v11 }
 0xf33   :  { %1394 = vrcp.f32 %v844_v34 }
 0xf40   :  { %v1395_v35 = vpop.eup %1394 }
 0xf41   :  { %v851_v25 = vmul.f32 %v1395_v35, %v849_v0 }
 0xfa1   :  { %v854_v22 = vpop.permute.xlu0 %853 }
 0xfa2   :  { %v856_v36 = vmul.f32 %v1395_v35, %v854_v22 }
 0xfa4   :  { %858 = vrot.lane.b32.xlu1 %v856_v36, %s1464_s30 }
0x1016   :  { %v859_v37 = vpop.permute.xlu1 %858 }
0x1017   :  { %v861_v38 = vadd.f32 %v859_v37, %v851_v25 }
0x1019   :  { %1396 = vtanh.f32 %v861_v38  ;;  %v956_v57 = vrot.slane %v861_v38, 6 }
0x1026   :  { %v1397_v39 = vpop.eup %1396 }
0x1027   :  { %864 = vrot.lane.b32.xlu0 %v1397_v39, %s1463_s29 }
0x1099   :  { %v865_v40 = vpop.permute.xlu0 %864 }
0x109a   :  { %v867_v41 = vmul.f32 %v1395_v35, %v865_v40 }
0x109c   :  { %v869_v42 = vrot.slane %v867_v41, 2 }
0x109e   :  { %870 = vrot.lane.b32.xlu1 %v869_v42, %s1464_s30 }
0x1110   :  { %v871_v43 = vpop.permute.xlu1 %870 }
0x1111   :  { %1328 = vmatmul.mubr.msk.f32.vlgmr.msra.gmra.mxu1 %vm239_vm2, %v871_v43 }
0x11d1   :  { %v940_v44 = vpop.f32.mrf.mxu1 }
0x11d2   :  { %v945_v45 = vrot.slane %v940_v44, 4 }
0x11d3   :  { %v1329_v47 = vpop.f32.mrf.mxu1 }
0x11d4   :  { %v947_v48 = vadd.f32 %v945_v45, %v1589_v50 }
0x11d6   :  { %1398 = vtanh.f32 %v947_v48  ;;  %v1132_v51 = vmul.f32 -1.442695, %v947_v48 }
0x11d8   :  { %1400 = vpow2.f32 %v1132_v51 }
0x11e3   :  { %v1399_v49 = vpop.eup %1398 }
0x11e4   :  { %960 = vrot.lane.b32.xlu0 %v1399_v49, %s1463_s29 }
0x11e5   :  { %v1401_v52 = vpop.eup %1400 }
0x11e6   :  { %v951_v53 = vadd.f32 1.0, %v1401_v52 }
0x11e8   :  { %1402 = vrcp.f32 %v951_v53 }
0x11f5   :  { %v1403_v54 = vpop.eup %1402 }
0x11f6   :  { %v958_v58 = vmul.f32 %v1403_v54, %v956_v57 }
0x1256   :  { %v961_v55 = vpop.permute.xlu0 %960 }
0x1257   :  { %v963_v56 = vmul.f32 %v1403_v54, %v961_v55 }
0x1259   :  { %965 = vrot.lane.b32.xlu1 %v963_v56, %s1464_s30 }
0x12cb   :  { %v966_v59 = vpop.permute.xlu1 %965 }
0x12cc   :  { %v968_v60 = vadd.f32 %v966_v59, %v958_v58 }
0x12ce   :  { %1404 = vtanh.f32 %v968_v60 }
0x12db   :  { %v1405_v61 = vpop.eup %1404 }
0x12dc   :  { %971 = vrot.lane.b32.xlu0 %v1405_v61, %s1463_s29 }
0x134e   :  { %v972_v62 = vpop.permute.xlu0 %971 }
0x134f   :  { %v974_v63 = vmul.f32 %v1403_v54, %v972_v62 }
0x1351   :  { %v976_v1 = vrot.slane %v974_v63, 4 }
0x1353   :  { %977 = vrot.lane.b32.xlu1 %v976_v1, %s1464_s30 }
0x13c5   :  { %v978_v2 = vpop.permute.xlu1 %977 }
0x13c6   :  { %1339 = vmatmul.mubr.msk.f32.vlgmr.msra.gmra.mxu0 %vm239_vm2, %v978_v2 }
0x1486   :  { %v1047_v46 = vpop.f32.mrf.mxu0 }
0x1487   :  { %v1052_v3 = vrot.slane %v1047_v46, 2 }
0x1488   :  { %v1340_v4 = vpop.f32.mrf.mxu0 }
0x1489   :  { %v1054_v5 = vadd.f32 %v1052_v3, %v1589_v50  ;;  %v1063_v50 = vrot.slane %v968_v60, 6 }
0x148b   :  { %1406 = vtanh.f32 %v1054_v5  ;;  %v1134_v8 = vmul.f32 -1.442695, %v1054_v5 }
0x148d   :  { %1408 = vpow2.f32 %v1134_v8 }
0x1498   :  { %v1407_v6 = vpop.eup %1406 }
0x1499   :  { %1067 = vrot.lane.b32.xlu0 %v1407_v6, %s1463_s29 }
0x149a   :  { %v1409_v9 = vpop.eup %1408 }
0x149b   :  { %v1058_v10 = vadd.f32 1.0, %v1409_v9 }
0x149d   :  { %1410 = vrcp.f32 %v1058_v10 }
0x14aa   :  { %v1411_v12 = vpop.eup %1410 }
0x14ab   :  { %v1065_v17 = vmul.f32 %v1411_v12, %v1063_v50 }
0x150b   :  { %v1068_v13 = vpop.permute.xlu0 %1067 }
0x150c   :  { %v1070_v14 = vmul.f32 %v1411_v12, %v1068_v13 }
0x150e   :  { %1072 = vrot.lane.b32.xlu1 %v1070_v14, %s1464_s30 }
0x1512   :  { %1088 = vrot.lane.b32.xlu1 %v1087_v16, %s1465_s6 }
0x1580   :  { %v1073_v18 = vpop.permute.xlu1 %1072 }
0x1581   :  { %v1075_v19 = vadd.f32 %v1073_v18, %v1065_v17 }
0x1583   :  { %1412 = vtanh.f32 %v1075_v19 }
0x1584   :  { %v1089_v23 = vpop.permute.xlu1 %1088 }
0x1590   :  { %v1413_v20 = vpop.eup %1412 }
0x1591   :  { %1078 = vrot.lane.b32.xlu0 %v1413_v20, %s1463_s29 }
0x1603   :  { %v1079_v21 = vpop.permute.xlu0 %1078 }
0x1604   :  { %v1081_v24 = vmul.f32 %v1411_v12, %v1079_v21 }
0x1606   :  { %v1091_v26 = vmul.f32 %v1089_v23, %v1081_v24 }
0x1608   :  { %1093 = vrot.lane.b32.xlu0 %v1091_v26, %s1464_s30 }
0x167a   :  { %v1094_v27 = vpop.permute.xlu0 %1093 }
0x167b   :  { %1097 = vst.msk [vmem:[#allocation5 + $0x2] sm:$0xc0] %vm1096_vm3, %v1094_v27 }
0x167c   :  { %1445 = shalt.err (!%p1442_p9)
}
0x167d   :  { %1109 = dma.vmem_to_hbm [thread:$0]  %s1104_s8, 256, %s1697_s3, [#allocation4], %s1459_s15, %s1459_s15, %s1460_s16  }
0x167e   :  { %1456 = dma.done.wait [#allocation4], 256  }
0x167f   :  { %1457 = vsyncadd [#allocation4], 4294967040 }
0x1680   :  { %1113 = vsyncpa [#allocation3], 1 }
0x1681   :  { %1114 = vsyncpa [#allocation4], 1 }

</bundles_post_ra>
